<compile_context>
chip_gen: v5e
topology: v5e:2x2
jax: 0.10.0
libtpu: 0.0.40
codegen_flags: <defaults>
</compile_context>

<pallas_src>
import functools

import jax
import jax.numpy as jnp
from jax.experimental import pallas as pl
from jax.experimental.pallas import tpu as pltpu


_MIN_TILE = 512                      # multiple of 128: lane-aligned tiles, unmasked stores
_VMEM_LIMIT = 32 * 1024 * 1024       # explicit (v5e scoped default is only 16 MiB)


# ------------------------------ small helpers ---------------------------------
def _round_up(v, m):
    return ((v + m - 1) // m) * m


def _prod_over_rows(a):
    """Product over axis 0 via a log-depth pairwise multiply tree. Returns (1, T)."""
    carry = None
    while a.shape[0] > 1:
        n = a.shape[0]
        if n % 2:                            # fold odd leftover row into a carry
            last = a[n - 1:n]
            carry = last if carry is None else carry * last
            a = a[:n - 1]
            n -= 1
        half = n // 2
        a = a[:half] * a[half:]
    return a if carry is None else a * carry


def _ipow(v, n):
    """v ** n for a static integer n >= 1 (exponentiation by squaring)."""
    assert n >= 1
    result, base = None, v
    while n:
        if n & 1:
            result = base if result is None else result * base
        n >>= 1
        if n:
            base = base * base
    return result


# ------------------------------- Pallas kernel --------------------------------
def _prodmlp_kernel(x_ref, apos_ref, aneg_ref, bias_ref, ot_ref, *, exponent, natural):
    # x_ref : (tile, F) if natural else (F, tile)  -- batch ends on the 128-lane axis
    # apos/aneg/bias : (O, 1) folded weight vectors (grid-invariant, VMEM resident)
    # ot_ref: (O, tile) lane-dense transposed output
    x = x_ref[...]
    if natural:
        x = jnp.transpose(x)                       # (F, tile): XLU, otherwise idle here
    px = _prod_over_rows(x)                        # (1, tile): prod over input features
    rp = jnp.maximum(px, 0.0)                      # relu(px)
    rn = jnp.maximum(-px, 0.0)                     # relu(-px)
    acc = (apos_ref[...] * _ipow(rp, exponent)
           + aneg_ref[...] * _ipow(rn, exponent)
           + bias_ref[...])                        # (O, tile) broadcast on the VPU
    ot_ref[...] = acc.astype(ot_ref.dtype)


def _launch(x_in, apos, aneg, bias, *, exponent, tile, natural):
    """One pallas_call over a 1-D batch grid; x_in is (B, F) [natural] or (F, B)."""
    O = apos.shape[0]
    if natural:
        B, F = x_in.shape
        x_spec = pl.BlockSpec((tile, F), lambda i: (i, 0))
    else:
        F, B = x_in.shape
        x_spec = pl.BlockSpec((F, tile), lambda i: (0, i))
    vec_spec = pl.BlockSpec((O, 1), lambda i: (0, 0))          # grid-invariant weights
    kernel = functools.partial(_prodmlp_kernel, exponent=exponent, natural=natural)
    return pl.pallas_call(
        kernel,
        out_shape=jax.ShapeDtypeStruct((O, B), jnp.float32),
        grid=(pl.cdiv(B, tile),),                              # ragged last block is OK
        in_specs=[x_spec, vec_spec, vec_spec, vec_spec],
        out_specs=pl.BlockSpec((O, tile), lambda i: (0, i)),   # lane-dense output
        compiler_params=pltpu.CompilerParams(
            dimension_semantics=("parallel",),                 # both TCs on v7x
            vmem_limit_bytes=_VMEM_LIMIT,
        ),
    )(x_in, apos, aneg, bias)


# -------------------------- weight folding (exact) -----------------------------
def _fold_params(prod_ws, wout, bout):
    """Weight-only ReLU/product folding of the ProdMLP stack.

    Returns (apos, aneg, bias) of shape (O, 1) and a static exponent N with
        out[b, :] = apos[:,0]*relu(px)**N + aneg[:,0]*relu(-px)**N + bias[:,0],
        px = prod_i x[b, i].
    """
    assert len(prod_ws) >= 1
    pws = [jnp.prod(w.astype(jnp.float32), axis=0) for w in prod_ws]   # (H_j,) each
    hs = [int(pw.shape[0]) for pw in pws]
    wout = wout.astype(jnp.float32)
    bout = bout.astype(jnp.float32)
    O = wout.shape[0]

    if len(pws) == 1:
        a_pos = wout @ jnp.maximum(pws[0], 0.0)
        a_neg = wout @ jnp.maximum(-pws[0], 0.0)
        n = 1
    else:
        c1p = jnp.prod(jnp.maximum(pws[0], 0.0))       # >0 only if all layer-1 prods > 0
        c1n = jnp.prod(jnp.maximum(-pws[0], 0.0))      # >0 only if all layer-1 prods < 0
        k = jnp.float32(1.0)                           # s_j = k * s_1 ** e   (s_j >= 0)
        e = 1
        for pw, h in zip(pws[1:-1], hs[1:-1]):
            cj = jnp.prod(jnp.maximum(pw, 0.0))
            k = cj * k ** h
            e = e * h
        a_eff = wout @ jnp.maximum(pws[-1], 0.0)       # (O,)
        a_pos = a_eff * (k * c1p ** e)
        a_neg = a_eff * (k * c1n ** e)
        n = hs[0] * e                                  # = prod(hiddens[:-1])
    return a_pos.reshape(O, 1), a_neg.reshape(O, 1), bout.reshape(O, 1), n


# ------------------------------ tile selection ---------------------------------
def _choose_batch_tile(B, max_tile):
    max_tile = max(_MIN_TILE, (max_tile // _MIN_TILE) * _MIN_TILE)
    if B <= _MIN_TILE:
        return _MIN_TILE
    n = pl.cdiv(B, max_tile)
    if n % 2:
        n += 1                                  # even tile count -> both TCs on v7x
    return min(max_tile, _round_up(pl.cdiv(B, n), _MIN_TILE))


# --------------------- natural-layout support probe (one-time) -----------------
_NATURAL_OK = None


def _natural_layout_ok():
    """Probe whether the in-kernel (tile, F)->(F, tile) transpose lowers & is correct."""
    global _NATURAL_OK
    if _NATURAL_OK is None:
        try:
            B, F = 256, 16
            kx, ks = jax.random.split(jax.random.PRNGKey(123))
            mag = jnp.exp(jax.random.uniform(kx, (B, F), jnp.float32, -0.1, 0.1))
            sgn = jnp.where(jax.random.bernoulli(ks, 0.5, (B, F)), 1.0, -1.0)
            x = mag * sgn
            apos = jnp.array([[1.0], [2.0], [-3.0], [0.5]], jnp.float32)
            aneg = jnp.array([[0.25], [-1.5], [4.0], [2.0]], jnp.float32)
            bias = jnp.array([[0.1], [0.2], [-0.3], [0.4]], jnp.float32)
            out = _launch(x, apos, aneg, bias, exponent=1, tile=128, natural=True)
            px = jnp.prod(x, axis=1)
            ref = (apos[:, 0][None, :] * jnp.maximum(px, 0.0)[:, None]
                   + aneg[:, 0][None, :] * jnp.maximum(-px, 0.0)[:, None]
                   + bias[:, 0][None, :])
            _NATURAL_OK = bool(jnp.allclose(out.T, ref, rtol=1e-4, atol=1e-4))
        except Exception:
            _NATURAL_OK = False
    return _NATURAL_OK


# ---------------------------------- wrapper -------------------------------------
def prodmlp_forward(x, w1, w2, wout, bout, *, batch_tile=8192, layout="auto"):
    """x: (B, input_dim); w1: (input_dim, H1); w2: (H1, H2);
    wout: (out_dim, H2) [PyTorch nn.Linear layout]; bout: (out_dim,)."""
    x = x.astype(jnp.float32)
    B0 = x.shape[0]
    apos, aneg, bias, n = _fold_params([w1, w2], wout, bout)

    # Tiny batches get one cheap pad up to a single lane-aligned tile; larger batches
    # are handled by Pallas' ragged final block (no pad, no extra HBM copy).
    if B0 < _MIN_TILE:
        x = jnp.pad(x, ((0, _MIN_TILE - B0), (0, 0)))
    B = x.shape[0]
    tile = _choose_batch_tile(B, batch_tile)

    if layout == "natural":
        natural = True
    elif layout == "transposed":
        natural = False
    else:
        natural = _natural_layout_ok()

    if natural:
        try:
            out_t = _launch(x, apos, aneg, bias, exponent=n, tile=tile, natural=True)
        except Exception:
            out_t = _launch(x.T, apos, aneg, bias, exponent=n, tile=tile, natural=False)
    else:
        out_t = _launch(x.T, apos, aneg, bias, exponent=n, tile=tile, natural=False)

    return out_t[:, :B0].T                           # (B, out_dim)


# ----------------------- pure-JAX reference (original math) ---------------------
def prodmlp_ref(x, w1, w2, wout, bout):
    h = jnp.prod(x[:, :, None] * w1[None, :, :], axis=1)
    h = jnp.maximum(h, 0.0)
    h = jnp.prod(h[:, :, None] * w2[None, :, :], axis=1)
    h = jnp.maximum(h, 0.0)
    return h @ wout.T + bout


# ---------------------------------- demo / test ---------------------------------
if __name__ == "__main__":
    # Module hyperparameters (consistent with ProdMLP.__init__):
    #   M1_dim=(2,4), M2_dim=(4,2) -> input_dim = 8 + 8 = 16, out_dim = 4; hiddens=[8,8]
    M1_dim, M2_dim = (2, 4), (4, 2)
    hiddens = [8, 8]
    input_dim = M1_dim[0] * M1_dim[1] + M2_dim[0] * M2_dim[1]   # 16
    out_dim = M1_dim[0] * M2_dim[1]                             # 4

    key = jax.random.PRNGKey(0)
    k1, k2, kw, kb, kxa, kxb = jax.random.split(key, 6)

    def near_one(k, shape):
        # magnitudes near 1 so the 16-way / 8-way products stay well inside f32 range
        return jnp.exp(jax.random.uniform(k, shape, jnp.float32, -0.08, 0.08))

    # ProdLayer weights (in_features, out_features).  w1_pos has all-positive per-output
    # weight products; w1_neg flips one row so every per-output product is negative --
    # together they exercise both ReLU branches non-degenerately.
    w1_pos = near_one(k1, (input_dim, hiddens[0]))
    w1_neg = w1_pos.at[0, :].multiply(-1.0)
    w2 = near_one(k2, (hiddens[0], hiddens[1]))
    w2 = w2.at[0, 1::2].multiply(-1.0)              # mixed-sign layer-2 weight products

    # nn.Linear(last_hidden, out_dim): weight (out_dim, last_hidden), bias (out_dim,)
    lin_bound = 1.0 / jnp.sqrt(jnp.float32(hiddens[-1]))
    wout = jax.random.uniform(kw, (out_dim, hiddens[-1]), jnp.float32, -lin_bound, lin_bound)
    bout = jax.random.uniform(kb, (out_dim,), jnp.float32, -lin_bound, lin_bound)

    def make_x(k, b):
        km, ks = jax.random.split(k)
        mag = jnp.exp(jax.random.uniform(km, (b, input_dim), jnp.float32, -0.1, 0.1))
        sgn = jnp.where(jax.random.bernoulli(ks, 0.5, (b, input_dim)), 1.0, -1.0)
        return mag * sgn

    def check(out, ref, what):
        err = float(jnp.max(jnp.abs(out - ref)) / (1.0 + jnp.max(jnp.abs(ref))))
        assert err < 1e-4, f"{what}: normalized max err {err:.3e}"

    # --- small batch implied by the module (B=2) ---
    x_small = make_x(kxa, 2)
    out_small = jax.block_until_ready(prodmlp_forward(x_small, w1_pos, w2, wout, bout))
    assert out_small.shape == (2, out_dim)
    check(out_small, prodmlp_ref(x_small, w1_pos, w2, wout, bout), "B=2")

    # --- larger, non-tile-multiple batch: even tile count + ragged last block ---
    x_big = make_x(kxb, 1031)
    out_big = jax.block_until_ready(prodmlp_forward(x_big, w1_pos, w2, wout, bout))
    assert out_big.shape == (1031, out_dim)
    check(out_big, prodmlp_ref(x_big, w1_pos, w2, wout, bout), "B=1031 (pos)")

    # --- negative layer-1 weight products: exercises the relu(-px) branch ---
    out_neg = jax.block_until_ready(prodmlp_forward(x_big, w1_neg, w2, wout, bout))
    check(out_neg, prodmlp_ref(x_big, w1_neg, w2, wout, bout), "B=1031 (neg)")

    print("KERNEL_OK")
</pallas_src>

<mosaic_0001>
module attributes {stable_mosaic.version = 11 : i64} {
  func.func @_prodmlp_kernel(%arg0: i32, %arg1: memref<128x16xf32, #tpu.memory_space<vmem>>, %arg2: memref<4x1xf32, #tpu.memory_space<vmem>>, %arg3: memref<4x1xf32, #tpu.memory_space<vmem>>, %arg4: memref<4x1xf32, #tpu.memory_space<vmem>>, %arg5: memref<4x128xf32, #tpu.memory_space<vmem>>) attributes {dimension_semantics = [#tpu.dimension_semantics<parallel>], iteration_bounds = array<i64: 2>, scalar_prefetch = 0 : i64, scratch_operands = 0 : i64, tpu.core_type = #tpu.core_type<tc>, window_params = [{transform_indices = @transform_0, window_bounds = array<i64: 128, 16>}, {pipeline_mode = #tpu.pipeline_mode<synchronous>, transform_indices = @transform_1, window_bounds = array<i64: 4, 1>}, {pipeline_mode = #tpu.pipeline_mode<synchronous>, transform_indices = @transform_2, window_bounds = array<i64: 4, 1>}, {pipeline_mode = #tpu.pipeline_mode<synchronous>, transform_indices = @transform_3, window_bounds = array<i64: 4, 1>}, {transform_indices = @transform_4, window_bounds = array<i64: 4, 128>}]} {
    %c0 = arith.constant 0 : index
    %c0_0 = arith.constant 0 : index
    %0 = vector.load %arg1[%c0, %c0_0] : memref<128x16xf32, #tpu.memory_space<vmem>>, vector<128x16xf32>
    %1 = tpu.transpose %0, [1, 0] : vector<128x16xf32> -> vector<16x128xf32>
    %2 = vector.extract_strided_slice %1 {offsets = [0, 0], sizes = [8, 128], strides = [1, 1]} : vector<16x128xf32> to vector<8x128xf32>
    %3 = vector.extract_strided_slice %1 {offsets = [8, 0], sizes = [8, 128], strides = [1, 1]} : vector<16x128xf32> to vector<8x128xf32>
    %4 = arith.mulf %2, %3 : vector<8x128xf32>
    %5 = vector.extract_strided_slice %4 {offsets = [0, 0], sizes = [4, 128], strides = [1, 1]} : vector<8x128xf32> to vector<4x128xf32>
    %6 = vector.extract_strided_slice %4 {offsets = [4, 0], sizes = [4, 128], strides = [1, 1]} : vector<8x128xf32> to vector<4x128xf32>
    %7 = arith.mulf %5, %6 : vector<4x128xf32>
    %8 = vector.extract_strided_slice %7 {offsets = [0, 0], sizes = [2, 128], strides = [1, 1]} : vector<4x128xf32> to vector<2x128xf32>
    %9 = vector.extract_strided_slice %7 {offsets = [2, 0], sizes = [2, 128], strides = [1, 1]} : vector<4x128xf32> to vector<2x128xf32>
    %10 = arith.mulf %8, %9 : vector<2x128xf32>
    %11 = vector.extract_strided_slice %10 {offsets = [0, 0], sizes = [1, 128], strides = [1, 1]} : vector<2x128xf32> to vector<1x128xf32>
    %12 = vector.extract_strided_slice %10 {offsets = [1, 0], sizes = [1, 128], strides = [1, 1]} : vector<2x128xf32> to vector<1x128xf32>
    %13 = arith.mulf %11, %12 : vector<1x128xf32>
    %cst = arith.constant 0.000000e+00 : f32
    %14 = vector.broadcast %cst : f32 to vector<1x128xf32>
    %15 = arith.maximumf %13, %14 : vector<1x128xf32>
    %cst_1 = arith.constant 0.000000e+00 : f32
    %16 = vector.broadcast %cst_1 : f32 to vector<1x128xf32>
    %17 = arith.subf %16, %13 : vector<1x128xf32>
    %cst_2 = arith.constant 0.000000e+00 : f32
    %18 = vector.broadcast %cst_2 : f32 to vector<1x128xf32>
    %19 = arith.maximumf %17, %18 : vector<1x128xf32>
    %c0_3 = arith.constant 0 : index
    %c0_4 = arith.constant 0 : index
    %20 = vector.load %arg2[%c0_3, %c0_4] : memref<4x1xf32, #tpu.memory_space<vmem>>, vector<4x1xf32>
    %21 = vector.broadcast %20 : vector<4x1xf32> to vector<4x128xf32>
    %22 = vector.broadcast %15 : vector<1x128xf32> to vector<4x128xf32>
    %23 = arith.mulf %21, %22 : vector<4x128xf32>
    %c0_5 = arith.constant 0 : index
    %c0_6 = arith.constant 0 : index
    %24 = vector.load %arg3[%c0_5, %c0_6] : memref<4x1xf32, #tpu.memory_space<vmem>>, vector<4x1xf32>
    %25 = vector.broadcast %24 : vector<4x1xf32> to vector<4x128xf32>
    %26 = vector.broadcast %19 : vector<1x128xf32> to vector<4x128xf32>
    %27 = arith.mulf %25, %26 : vector<4x128xf32>
    %28 = arith.addf %23, %27 : vector<4x128xf32>
    %c0_7 = arith.constant 0 : index
    %c0_8 = arith.constant 0 : index
    %29 = vector.load %arg4[%c0_7, %c0_8] : memref<4x1xf32, #tpu.memory_space<vmem>>, vector<4x1xf32>
    %30 = vector.broadcast %29 : vector<4x1xf32> to vector<4x128xf32>
    %31 = arith.addf %28, %30 : vector<4x128xf32>
    %c0_9 = arith.constant 0 : index
    %c0_10 = arith.constant 0 : index
    %32 = vector.load %arg5[%c0_9, %c0_10] : memref<4x128xf32, #tpu.memory_space<vmem>>, vector<4x128xf32>
    tpu.vector_store %arg5[%c0_9, %c0_10], %31 {strides = array<i32>} : memref<4x128xf32, #tpu.memory_space<vmem>>, vector<4x128xf32>,
    return
  }
  func.func @transform_0(%arg0: i32) -> (i32, i32) {
    %c0_i32 = arith.constant 0 : i32
    %c0_i32_0 = arith.constant 0 : i32
    return %arg0, %c0_i32 : i32, i32
  }
  func.func @transform_1(%arg0: i32) -> (i32, i32) {
    %c0_i32 = arith.constant 0 : i32
    %c0_i32_0 = arith.constant 0 : i32
    %c0_i32_1 = arith.constant 0 : i32
    return %c0_i32, %c0_i32_0 : i32, i32
  }
  func.func @transform_2(%arg0: i32) -> (i32, i32) {
    %c0_i32 = arith.constant 0 : i32
    %c0_i32_0 = arith.constant 0 : i32
    %c0_i32_1 = arith.constant 0 : i32
    return %c0_i32, %c0_i32_0 : i32, i32
  }
  func.func @transform_3(%arg0: i32) -> (i32, i32) {
    %c0_i32 = arith.constant 0 : i32
    %c0_i32_0 = arith.constant 0 : i32
    %c0_i32_1 = arith.constant 0 : i32
    return %c0_i32, %c0_i32_0 : i32, i32
  }
  func.func @transform_4(%arg0: i32) -> (i32, i32) {
    %c0_i32 = arith.constant 0 : i32
    %c0_i32_0 = arith.constant 0 : i32
    return %c0_i32, %arg0 : i32, i32
  }
}

module attributes {stable_mosaic.version = 11 : i64} {
  func.func @_prodmlp_kernel(%arg0: i32, %arg1: memref<16x512xf32, #tpu.memory_space<vmem>>, %arg2: memref<4x1xf32, #tpu.memory_space<vmem>>, %arg3: memref<4x1xf32, #tpu.memory_space<vmem>>, %arg4: memref<4x1xf32, #tpu.memory_space<vmem>>, %arg5: memref<4x512xf32, #tpu.memory_space<vmem>>) attributes {dimension_semantics = [#tpu.dimension_semantics<parallel>], iteration_bounds = array<i64: 1>, scalar_prefetch = 0 : i64, scratch_operands = 0 : i64, tpu.core_type = #tpu.core_type<tc>, window_params = [{transform_indices = @transform_0, window_bounds = array<i64: 16, 512>}, {pipeline_mode = #tpu.pipeline_mode<synchronous>, transform_indices = @transform_1, window_bounds = array<i64: 4, 1>}, {pipeline_mode = #tpu.pipeline_mode<synchronous>, transform_indices = @transform_2, window_bounds = array<i64: 4, 1>}, {pipeline_mode = #tpu.pipeline_mode<synchronous>, transform_indices = @transform_3, window_bounds = array<i64: 4, 1>}, {transform_indices = @transform_4, window_bounds = array<i64: 4, 512>}]} {
    %c0 = arith.constant 0 : index
    %c0_0 = arith.constant 0 : index
    %0 = vector.load %arg1[%c0, %c0_0] : memref<16x512xf32, #tpu.memory_space<vmem>>, vector<16x512xf32>
    %1 = vector.extract_strided_slice %0 {offsets = [0, 0], sizes = [8, 512], strides = [1, 1]} : vector<16x512xf32> to vector<8x512xf32>
    %2 = vector.extract_strided_slice %0 {offsets = [8, 0], sizes = [8, 512], strides = [1, 1]} : vector<16x512xf32> to vector<8x512xf32>
    %3 = arith.mulf %1, %2 : vector<8x512xf32>
    %4 = vector.extract_strided_slice %3 {offsets = [0, 0], sizes = [4, 512], strides = [1, 1]} : vector<8x512xf32> to vector<4x512xf32>
    %5 = vector.extract_strided_slice %3 {offsets = [4, 0], sizes = [4, 512], strides = [1, 1]} : vector<8x512xf32> to vector<4x512xf32>
    %6 = arith.mulf %4, %5 : vector<4x512xf32>
    %7 = vector.extract_strided_slice %6 {offsets = [0, 0], sizes = [2, 512], strides = [1, 1]} : vector<4x512xf32> to vector<2x512xf32>
    %8 = vector.extract_strided_slice %6 {offsets = [2, 0], sizes = [2, 512], strides = [1, 1]} : vector<4x512xf32> to vector<2x512xf32>
    %9 = arith.mulf %7, %8 : vector<2x512xf32>
    %10 = vector.extract_strided_slice %9 {offsets = [0, 0], sizes = [1, 512], strides = [1, 1]} : vector<2x512xf32> to vector<1x512xf32>
    %11 = vector.extract_strided_slice %9 {offsets = [1, 0], sizes = [1, 512], strides = [1, 1]} : vector<2x512xf32> to vector<1x512xf32>
    %12 = arith.mulf %10, %11 : vector<1x512xf32>
    %cst = arith.constant 0.000000e+00 : f32
    %13 = vector.broadcast %cst : f32 to vector<1x512xf32>
    %14 = arith.maximumf %12, %13 : vector<1x512xf32>
    %cst_1 = arith.constant 0.000000e+00 : f32
    %15 = vector.broadcast %cst_1 : f32 to vector<1x512xf32>
    %16 = arith.subf %15, %12 : vector<1x512xf32>
    %cst_2 = arith.constant 0.000000e+00 : f32
    %17 = vector.broadcast %cst_2 : f32 to vector<1x512xf32>
    %18 = arith.maximumf %16, %17 : vector<1x512xf32>
    %c0_3 = arith.constant 0 : index
    %c0_4 = arith.constant 0 : index
    %19 = vector.load %arg2[%c0_3, %c0_4] : memref<4x1xf32, #tpu.memory_space<vmem>>, vector<4x1xf32>
    %20 = arith.mulf %14, %14 : vector<1x512xf32>
    %21 = arith.mulf %20, %20 : vector<1x512xf32>
    %22 = arith.mulf %21, %21 : vector<1x512xf32>
    %23 = vector.broadcast %19 : vector<4x1xf32> to vector<4x512xf32>
    %24 = vector.broadcast %22 : vector<1x512xf32> to vector<4x512xf32>
    %25 = arith.mulf %23, %24 : vector<4x512xf32>
    %c0_5 = arith.constant 0 : index
    %c0_6 = arith.constant 0 : index
    %26 = vector.load %arg3[%c0_5, %c0_6] : memref<4x1xf32, #tpu.memory_space<vmem>>, vector<4x1xf32>
    %27 = arith.mulf %18, %18 : vector<1x512xf32>
    %28 = arith.mulf %27, %27 : vector<1x512xf32>
    %29 = arith.mulf %28, %28 : vector<1x512xf32>
    %30 = vector.broadcast %26 : vector<4x1xf32> to vector<4x512xf32>
    %31 = vector.broadcast %29 : vector<1x512xf32> to vector<4x512xf32>
    %32 = arith.mulf %30, %31 : vector<4x512xf32>
    %33 = arith.addf %25, %32 : vector<4x512xf32>
    %c0_7 = arith.constant 0 : index
    %c0_8 = arith.constant 0 : index
    %34 = vector.load %arg4[%c0_7, %c0_8] : memref<4x1xf32, #tpu.memory_space<vmem>>, vector<4x1xf32>
    %35 = vector.broadcast %34 : vector<4x1xf32> to vector<4x512xf32>
    %36 = arith.addf %33, %35 : vector<4x512xf32>
    %c0_9 = arith.constant 0 : index
    %c0_10 = arith.constant 0 : index
    %37 = vector.load %arg5[%c0_9, %c0_10] : memref<4x512xf32, #tpu.memory_space<vmem>>, vector<4x512xf32>
    tpu.vector_store %arg5[%c0_9, %c0_10], %36 {strides = array<i32>} : memref<4x512xf32, #tpu.memory_space<vmem>>, vector<4x512xf32>,
    return
  }
  func.func @transform_0(%arg0: i32) -> (i32, i32) {
    %c0_i32 = arith.constant 0 : i32
    %c0_i32_0 = arith.constant 0 : i32
    return %c0_i32, %arg0 : i32, i32
  }
  func.func @transform_1(%arg0: i32) -> (i32, i32) {
    %c0_i32 = arith.constant 0 : i32
    %c0_i32_0 = arith.constant 0 : i32
    %c0_i32_1 = arith.constant 0 : i32
    return %c0_i32, %c0_i32_0 : i32, i32
  }
  func.func @transform_2(%arg0: i32) -> (i32, i32) {
    %c0_i32 = arith.constant 0 : i32
    %c0_i32_0 = arith.constant 0 : i32
    %c0_i32_1 = arith.constant 0 : i32
    return %c0_i32, %c0_i32_0 : i32, i32
  }
  func.func @transform_3(%arg0: i32) -> (i32, i32) {
    %c0_i32 = arith.constant 0 : i32
    %c0_i32_0 = arith.constant 0 : i32
    %c0_i32_1 = arith.constant 0 : i32
    return %c0_i32, %c0_i32_0 : i32, i32
  }
  func.func @transform_4(%arg0: i32) -> (i32, i32) {
    %c0_i32 = arith.constant 0 : i32
    %c0_i32_0 = arith.constant 0 : i32
    return %c0_i32, %arg0 : i32, i32
  }
}

</mosaic_0001>

<bundles_post_ra>
// kernel: tpu_custom_call.1
= control target key start
LH: loop header
LB: loop body
LE: loop exit
PB: predicated region body
PF: predicated region fallthrough
CT: control target
= control target key end

     0   :  { %9 = vsyncpa [#allocation3], 0  ;;  %s620_s0 = inlined_call_operand.vmem [shape: f32[256,16], index: 0, kind: input, shape index: {}]   ;;  %s621_s1 = inlined_call_operand.vmem [shape: f32[4,1], index: 1, kind: input, shape index: {}]   ;;  %s622_s2 = inlined_call_operand.vmem [shape: f32[4,1], index: 2, kind: input, shape index: {}]   ;;  %s623_s3 = inlined_call_operand.vmem [shape: f32[4,1], index: 3, kind: input, shape index: {}]   ;;  %s624_s4 = inlined_call_operand.hbm [shape: f32[4,256], index: 4, kind: output, shape index: {}]  }
   0x1   :  { %11 = vsyncpa [#allocation3 + $0x1], 0  ;;  %s506_s15 = smov 0   ;;  %s508_s16 = smov 0  }
   0x2   :  { %s510_s17 = smov 0   ;;  %s512_s18 = smov 0  }
   0x3 LB: > { %s527_s19 = sadd.s32 4294967295, %s478_s18   ;;  %s362_s20 = sadd.s32 4294967294, %s478_s18   ;;  %s478_s18 = sphi %s512_s18, %s630_s18   ;;  %s474_s17 = sphi %s510_s17, %s629_s17   ;;  %s470_s16 = sphi %s508_s16, %s628_s16   ;;  %s466_s15 = sphi %s506_s15, %s627_s15  }
   0x4   : > { %s531_s21 = sadd.s32 1, %s478_s18   ;;  %s113_s22 = sadd.s32 1, %s474_s17 }
   0x5   : > { %s110_s23 = ssub.s32 %s478_s18, %s531_s21  ;;  %p123_p0 = scmp.ne.s32.totalorder %s474_s17, %s470_s16 }
   0x6   : > { %p111_p1 = scmp.eq.s32.totalorder %s110_s23, 0  ;;  %p124_p2 = scmp.eq.s32.totalorder %s527_s19, 1 }
   0x7   : > { %p129_p3 = scmp.ne.s32.totalorder %s470_s16, %s466_s15  ;;  %p130_p4 = scmp.eq.s32.totalorder %s362_s20, 1 }
   0x8   : > { %s542_s24 = scalar_select %p111_p1, %s474_s17, %s113_s22  }
   0x9   : > { %p544_p5 = por %p124_p2, %p123_p0  ;;  %p548_p6 = por %p130_p4, %p129_p3 }
   0xa   : > { %p365_p7 = scmp.ge.s32.totalorder %s478_s18, 1  ;;  %p166_p8 = scmp.lt.s32.totalorder %s478_s18, 3 }
   0xc   : > { %p167_p9 = pnand %p365_p7, %p166_p8 }
   0xd   : > { %s367_s27 = sshll.u32 (!%p167_p9), %s527_s19, 4  ;;  %s189_s12 = sand.u32 (!%p167_p9), 1, %s470_s16  }
   0xe   : > { %170 = sbr.rel (%p167_p9) target bundleno = 247 (0xf7), region = 36  ;;  %p193_p10 = scmp.lt.s32.totalorder (!%p167_p9), %s367_s27, 31 }
   0xf   : > { %s370_s13 = sshll.u32 (!%p167_p9), %s527_s19, 2  ;;  %s366_s14 = sshll.u32 (!%p167_p9), %s189_s12, 2 }
  0x10   : > { %s298_s23 = scalar_lea.hbm (!%p167_p9), %s624_s4, %s370_s13  ;;  %s288_s19 = scalar_lea.sflag (!%p167_p9), [#allocation3], %s189_s12 }
  0x11   : > { %s302_s29 = sshll.u32 (!%p167_p9), %s298_s23, 4  ;;  %s436_s8 = scalar_lea.hbm (!%p167_p9), %s624_s4, 8  ;;  %s303_s29 = int_to_ptr.hbm [resolvable:$true] %s302_s29 }
  0x12   : > { %s430_s30 = sshra.s32 (!%p167_p9), %s303_s29, 4  ;;  %s431_s30 = int_to_ptr.hbm [resolvable:$true] %s430_s30 }
  0x13   : > { %s632_s27 = smov (!%p193_p10, %s367_s27), 31  ;;  %v262_v6 = vld [vmem:[%s621_s1] sm:$0xf]  ;;  %v480_v7 = vmov 0   ;;  %p437_p0 = scmp.lt.s32.totalorder %s431_s30, %s624_s4 }
  0x14   : > { %s368_s28 = sshll.u32 %s632_s27, 3  ;;  %413 = vset.pattern.permute.xlu1 %v480_v7  ;;  %414 = vset.pattern.permute.xlu2 %v480_v7  ;;  %v270_v9 = vld [vmem:[%s622_s2] sm:$0xf]  ;;  %s191_s27 = scalar_lea.vmem [#allocation2], %s366_s14 }
  0x15   : > { %s558_s5 = scalar_lea.vmem %s620_s0, %s368_s28  ;;  %265 = vperm.xlu1 %413, %v262_v6   ;;  %v279_v14 = vld [vmem:[%s623_s3] sm:$0xf]  ;;  %s300_s28 = sshll.u32 %s191_s27, 4  ;;  %s301_s28 = int_to_ptr.vmem [resolvable:$true] %s300_s28 }
  0x16   : > { %v198_v0 = vld [vmem:[%s558_s5] sm:$0xff]  ;;  %v199_v1 = vld [vmem:[%s558_s5 + $0x8] sm:$0xff]  ;;  %v200_v2 = vld [vmem:[%s558_s5 + $0x10] sm:$0xff]  ;;  %282 = vperm.xlu2 %414, %v279_v14  }
  0x17   : > { %214 = vxpose.xlu0.b32.start [1/16] (narrow) %v198_v0, 16  ;;  %v201_v3 = vld [vmem:[%s558_s5 + $0x18] sm:$0xff]  ;;  %v202_v4 = vld [vmem:[%s558_s5 + $0x20] sm:$0xff]  ;;  %v203_v5 = vld [vmem:[%s558_s5 + $0x28] sm:$0xff] }
  0x18   : > { %v204_v8 = vld [vmem:[%s558_s5 + $0x30] sm:$0xff]  ;;  %v205_v10 = vld [vmem:[%s558_s5 + $0x38] sm:$0xff]  ;;  %v206_v11 = vld [vmem:[%s558_s5 + $0x40] sm:$0xff] }
  0x19   : > { %v207_v12 = vld [vmem:[%s558_s5 + $0x48] sm:$0xff]  ;;  %v208_v13 = vld [vmem:[%s558_s5 + $0x50] sm:$0xff]  ;;  %v209_v15 = vld [vmem:[%s558_s5 + $0x58] sm:$0xff] }
  0x1a   : > { %v210_v16 = vld [vmem:[%s558_s5 + $0x60] sm:$0xff]  ;;  %v211_v17 = vld [vmem:[%s558_s5 + $0x68] sm:$0xff]  ;;  %v212_v18 = vld [vmem:[%s558_s5 + $0x70] sm:$0xff] }
  0x1b   : > { %v213_v19 = vld [vmem:[%s558_s5 + $0x78] sm:$0xff]  ;;  %s432_s5 = scalar_lea.hbm %s431_s30, 4 }
  0x1c   : > { %p433_p11 = scmp.ne.s32.totalorder %s431_s30, %s432_s5  ;;  %p438_p1 = scmp.lt.s32.totalorder %s436_s8, %s432_s5 }
  0x1d   : > { %273 = vperm.xlu1 %413, %v270_v9  }
  0x1e   : > { %p434_p12 = pnand %p433_p11, %p544_p5  ;;  %p439_p2 = por %p438_p1, %p437_p0 }
  0x1f   : > { %215 = vxpose.xlu0.b32.cont [2/16] (narrow) %v199_v1, 16 }
  0x20   : > { %p435_p13 = pneg %p434_p12 }
  0x22   : > { %p440_p3 = pnand %p439_p2, %p435_p13 }
  0x27   : > { %216 = vxpose.xlu0.b32.cont [3/16] (narrow) %v200_v2, 16 }
  0x2f   : > { %217 = vxpose.xlu0.b32.cont [4/16] (narrow) %v201_v3, 16 }
  0x37   : > { %218 = vxpose.xlu0.b32.cont [5/16] (narrow) %v202_v4, 16 }
  0x3f   : > { %219 = vxpose.xlu0.b32.cont [6/16] (narrow) %v203_v5, 16 }
  0x47   : > { %220 = vxpose.xlu0.b32.cont [7/16] (narrow) %v204_v8, 16 }
  0x4f   : > { %221 = vxpose.xlu0.b32.cont [8/16] (narrow) %v205_v10, 16 }
  0x57   : > { %222 = vxpose.xlu0.b32.cont [9/16] (narrow) %v206_v11, 16 }
  0x5f   : > { %223 = vxpose.xlu0.b32.cont [10/16] (narrow) %v207_v12, 16 }
  0x67   : > { %224 = vxpose.xlu0.b32.cont [11/16] (narrow) %v208_v13, 16 }
  0x6f   : > { %225 = vxpose.xlu0.b32.cont [12/16] (narrow) %v209_v15, 16 }
  0x70   : > { %v283_v38 = vpop.permute.xlu2 %282 }
  0x77   : > { %226 = vxpose.xlu0.b32.cont [13/16] (narrow) %v210_v16, 16 }
  0x7f   : > { %227 = vxpose.xlu0.b32.cont [14/16] (narrow) %v211_v17, 16 }
  0x87   : > { %228 = vxpose.xlu0.b32.cont [15/16] (narrow) %v212_v18, 16  ;;  %v266_v26 = vpop.permute.xlu1 %265 }
  0x8f   : > { %229 = vxpose.xlu0.b32.end [16/16] (narrow) %v213_v19, 16  ;;  %v274_v34 = vpop.permute.xlu1 %273 }
  0xbb   : > { %v230_v20 = vpop.trf.xlu0 }
  0xc3   : > { %v231_v21 = vpop.trf.xlu0 }
  0xc4   : > { %v246_v22 = vmul.f32 %v231_v21, %v230_v20 }
  0xc6   : > { %v248_v23 = vrot.slane %v246_v22, 4 }
  0xc8   : > { %v250_v24 = vmul.f32 %v248_v23, %v246_v22 }
  0xca   : > { %v252_v25 = vrot.slane %v250_v24, 2 }
  0xcc   : > { %v254_v27 = vmul.f32 %v252_v25, %v250_v24 }
  0xce   : > { %v256_v28 = vrot.slane %v254_v27, 1 }
  0xd0   : > { %v258_v29 = vmul.f32 %v256_v28, %v254_v27 }
  0xd2   : > { %v259_v30 = vmax.f32 %v258_v29, 0.0  ;;  %v260_v31 = vsub.f32 0.0, %v258_v29 }
  0xd4   : > { %v268_v32 = vperm.slane %v259_v30, 0  ;;  %v261_v33 = vmax.f32 %v260_v31, 0.0 }
  0xd6   : > { %v269_v35 = vmul.f32 %v268_v32, %v266_v26  ;;  %v276_v36 = vperm.slane %v261_v33, 0 }
  0xd8   : > { %v277_v37 = vmul.f32 %v276_v36, %v274_v34 }
  0xda   : > { %v278_v39 = vadd.f32 %v277_v37, %v269_v35 }
  0xdc   : > { %v285_v40 = vadd.f32 %v283_v38, %v278_v39 }
  0xde   : > { %286 = vst [vmem:[%s191_s27] sm:$0xf] %v285_v40 }
  0xdf   : > { %443 = shalt.err (!%p440_p3)
}
  0xe0   : > { %373 = dma.vmem_to_hbm [thread:$0]  (%p544_p5), %s301_s28, 64, %s303_s29, %s288_s19  }
  0xf6   : > { %415 = vset.pattern.permute.xlu0 %v480_v7 }
  0xf7 PF: > { %p379_p4 = scmp.ge.s32.totalorder %s478_s18, 2  ;;  %s314_s11 = sand.u32 1, %s466_s15  }
  0xf8   : > { %s315_s12 = scalar_lea.sflag [#allocation3], %s314_s11 }
  0xf9   : > { %p376_p7 = pnand %p379_p4, %p548_p6 }
  0xfb   : > { %p377_p8 = pneg %p376_p7 }
  0xfd   : > { %461 = dma.done.wait (%p377_p8), %s315_s12, 64  }
  0xfe   : > { %463 = vsyncadd (%p377_p8), %s315_s12, 4294967232  ;;  %p14_p5 = scmp.ge.s32.totalorder %s531_s21, 4   ;;  %s627_s15 = smov %s470_s16 }
  0xff   : > { %s628_s16 = smov %s474_s17  ;;  %s629_s17 = smov %s542_s24 }
 0x100   : > { %s630_s18 = smov %s531_s21  ;;  %16 = sbr.rel (!%p14_p5) target bundleno = 3 (0x3), region = 71 }
 0x105   :  { %321 = vsyncpa [#allocation3], 1 }
 0x106   :  { %323 = vsyncpa [#allocation3 + $0x1], 1 }

// kernel: tpu_custom_call.1
= control target key start
LH: loop header
LB: loop body
LE: loop exit
PB: predicated region body
PF: predicated region fallthrough
CT: control target
= control target key end

     0   :  { %9 = vsyncpa [#allocation3], 0  ;;  %s306_s0 = inlined_call_operand.hbm [shape: f32[16,512], index: 0, kind: input, shape index: {}]   ;;  %s307_s1 = inlined_call_operand.vmem [shape: f32[4,1], index: 1, kind: input, shape index: {}]   ;;  %s308_s2 = inlined_call_operand.vmem [shape: f32[4,1], index: 2, kind: input, shape index: {}]   ;;  %s309_s3 = inlined_call_operand.vmem [shape: f32[4,1], index: 3, kind: input, shape index: {}]   ;;  %s310_s4 = inlined_call_operand.hbm [shape: f32[4,512], index: 4, kind: output, shape index: {}]  }
   0x1   :  { %10 = vsyncpa [#allocation4], 0  ;;  %s15_s17 = sshll.u32 %s306_s0, 4  ;;  %s261_s18 = smov [#allocation2]   ;;  %s16_s17 = int_to_ptr.hbm [resolvable:$true] %s15_s17 }
   0x2   :  { %s17_s19 = sshll.u32 %s261_s18, 4  ;;  %s262_s20 = smov 512   ;;  %s18_s19 = int_to_ptr.vmem [resolvable:$true] %s17_s19 }
   0x3   :  { %s263_s21 = smov 32  }
   0x4   :  { %23 = dma.hbm_to_vmem [thread:$0]  %s16_s17, 1024, %s18_s19, [#allocation3], %s262_s20, %s262_s20, %s263_s21  }
   0x5   :  { %257 = dma.done.wait [#allocation3], 1024  }
   0x6   :  { %258 = vsyncadd [#allocation3], 4294966272  ;;  %v264_v0 = vmov 0   ;;  %v106_v1 = vld [vmem:[%s307_s1] sm:$0xf]  ;;  %v35_v5 = vld [vmem:[#allocation2 + $0x8] sm:$0xff] }
   0x7   :  { %207 = vset.pattern.permute.xlu0 %v264_v0  ;;  %208 = vset.pattern.permute.xlu1 %v264_v0  ;;  %v162_v2 = vld [vmem:[%s309_s3] sm:$0xf]  ;;  %v36_v6 = vld [vmem:[#allocation2 + $0x10] sm:$0xff]  ;;  %v37_v7 = vld [vmem:[#allocation2 + $0x18] sm:$0xff]  ;;  %vm178_vm0 = vcmask 1043456   ;;  %s265_s1 = smov [#allocation5]  }
   0x8   :  { %121 = vperm.xlu0 %207, %v106_v1   ;;  %165 = vperm.xlu1 %208, %v162_v2   ;;  %v132_v3 = vld [vmem:[%s308_s2] sm:$0xf]  ;;  %v39_v9 = vld [vmem:[#allocation2 + $0x28] sm:$0xff]  ;;  %v40_v10 = vld [vmem:[#allocation2 + $0x30] sm:$0xff]  ;;  %s190_s2 = sshll.u32 %s265_s1, 4  ;;  %s192_s28 = sshll.u32 %s310_s4, 4  ;;  %s191_s2 = int_to_ptr.vmem [resolvable:$true] %s190_s2  ;;  %s193_s28 = int_to_ptr.hbm [resolvable:$true] %s192_s28 }
   0x9   :  { %v34_v4 = vld [vmem:[#allocation2] sm:$0xff]  ;;  %v41_v11 = vld [vmem:[#allocation2 + $0x38] sm:$0xff]  ;;  %v43_v13 = vmul.f32 %v39_v9, %v35_v5  ;;  %v44_v14 = vmul.f32 %v40_v10, %v36_v6 }
   0xa   :  { %v38_v8 = vld [vmem:[#allocation2 + $0x20] sm:$0xff]  ;;  %v45_v15 = vmul.f32 %v41_v11, %v37_v7 }
   0xb   :  { %v42_v12 = vmul.f32 %v38_v8, %v34_v4  ;;  %v51_v17 = vrot.slane %v43_v13, 4  ;;  %v52_v18 = vrot.slane %v44_v14, 4 }
   0xc   :  { %v53_v19 = vrot.slane %v45_v15, 4 }
   0xd   :  { %v50_v16 = vrot.slane %v42_v12, 4  ;;  %v59_v21 = vmul.f32 %v51_v17, %v43_v13  ;;  %v60_v22 = vmul.f32 %v52_v18, %v44_v14 }
   0xe   :  { %v61_v23 = vmul.f32 %v53_v19, %v45_v15 }
   0xf   :  { %v58_v20 = vmul.f32 %v50_v16, %v42_v12  ;;  %v67_v25 = vrot.slane %v59_v21, 2  ;;  %v68_v26 = vrot.slane %v60_v22, 2 }
  0x10   :  { %147 = vperm.xlu0 %207, %v132_v3   ;;  %v69_v27 = vrot.slane %v61_v23, 2 }
  0x11   :  { %v66_v24 = vrot.slane %v58_v20, 2  ;;  %v75_v29 = vmul.f32 %v67_v25, %v59_v21  ;;  %v76_v30 = vmul.f32 %v68_v26, %v60_v22 }
  0x12   :  { %v77_v31 = vmul.f32 %v69_v27, %v61_v23 }
  0x13   :  { %v74_v28 = vmul.f32 %v66_v24, %v58_v20  ;;  %v83_v33 = vrot.slane %v75_v29, 1  ;;  %v84_v34 = vrot.slane %v76_v30, 1 }
  0x14   :  { %v85_v35 = vrot.slane %v77_v31, 1 }
  0x15   :  { %v82_v32 = vrot.slane %v74_v28, 1  ;;  %v91_v37 = vmul.f32 %v83_v33, %v75_v29  ;;  %v92_v38 = vmul.f32 %v84_v34, %v76_v30 }
  0x16   :  { %v93_v39 = vmul.f32 %v85_v35, %v77_v31 }
  0x17   :  { %v90_v36 = vmul.f32 %v82_v32, %v74_v28  ;;  %v99_v41 = vsub.f32 0.0, %v91_v37  ;;  %v100_v42 = vsub.f32 0.0, %v92_v38  ;;  %v95_v45 = vmax.f32 %v91_v37, 0.0 }
  0x18   :  { %v101_v43 = vsub.f32 0.0, %v93_v39  ;;  %v96_v46 = vmax.f32 %v92_v38, 0.0  ;;  %v97_v47 = vmax.f32 %v93_v39, 0.0 }
  0x19   :  { %v98_v40 = vsub.f32 0.0, %v90_v36  ;;  %v94_v44 = vmax.f32 %v90_v36, 0.0  ;;  %v103_v49 = vmax.f32 %v99_v41, 0.0  ;;  %v104_v50 = vmax.f32 %v100_v42, 0.0 }
  0x1a   :  { %v105_v51 = vmax.f32 %v101_v43, 0.0  ;;  %v108_v53 = vmul.f32 %v95_v45, %v95_v45  ;;  %v109_v54 = vmul.f32 %v96_v46, %v96_v46  ;;  %v110_v55 = vmul.f32 %v97_v47, %v97_v47 }
  0x1b   :  { %v102_v48 = vmax.f32 %v98_v40, 0.0  ;;  %v107_v52 = vmul.f32 %v94_v44, %v94_v44  ;;  %v134_v57 = vmul.f32 %v103_v49, %v103_v49  ;;  %v135_v58 = vmul.f32 %v104_v50, %v104_v50 }
  0x1c   :  { %v136_v59 = vmul.f32 %v105_v51, %v105_v51  ;;  %v112_v61 = vmul.f32 %v108_v53, %v108_v53  ;;  %v113_v62 = vmul.f32 %v109_v54, %v109_v54  ;;  %v114_v63 = vmul.f32 %v110_v55, %v110_v55 }
  0x1d   :  { %v133_v56 = vmul.f32 %v102_v48, %v102_v48  ;;  %v111_v60 = vmul.f32 %v107_v52, %v107_v52  ;;  %v138_v1 = vmul.f32 %v134_v57, %v134_v57  ;;  %v139_v2 = vmul.f32 %v135_v58, %v135_v58 }
  0x1e   :  { %v140_v3 = vmul.f32 %v136_v59, %v136_v59  ;;  %v116_v6 = vmul.f32 %v112_v61, %v112_v61  ;;  %v117_v7 = vmul.f32 %v113_v62, %v113_v62  ;;  %v118_v8 = vmul.f32 %v114_v63, %v114_v63 }
  0x1f   :  { %v137_v0 = vmul.f32 %v133_v56, %v133_v56  ;;  %v115_v5 = vmul.f32 %v111_v60, %v111_v60  ;;  %v142_v10 = vmul.f32 %v138_v1, %v138_v1  ;;  %v143_v11 = vmul.f32 %v139_v2, %v139_v2 }
  0x20   :  { %v144_v12 = vmul.f32 %v140_v3, %v140_v3  ;;  %v125_v14 = vperm.slane %v116_v6, 0  ;;  %v126_v15 = vperm.slane %v117_v7, 0  ;;  %v127_v16 = vperm.slane %v118_v8, 0 }
  0x21   :  { %v141_v9 = vmul.f32 %v137_v0, %v137_v0  ;;  %v124_v13 = vperm.slane %v115_v5, 0  ;;  %v151_v18 = vperm.slane %v142_v10, 0  ;;  %v152_v19 = vperm.slane %v143_v11, 0 }
  0x22   :  { %v153_v20 = vperm.slane %v144_v12, 0 }
  0x23   :  { %v150_v17 = vperm.slane %v141_v9, 0 }
  0x7a   :  { %v122_v4 = vpop.permute.xlu0 %121  ;;  %v166_v30 = vpop.permute.xlu1 %165 }
  0x7b   :  { %v128_v21 = vmul.f32 %v124_v13, %v122_v4  ;;  %v129_v22 = vmul.f32 %v125_v14, %v122_v4  ;;  %v130_v23 = vmul.f32 %v126_v15, %v122_v4  ;;  %v131_v24 = vmul.f32 %v127_v16, %v122_v4 }
  0x82   :  { %v148_v25 = vpop.permute.xlu0 %147 }
  0x83   :  { %v154_v26 = vmul.f32 %v150_v17, %v148_v25  ;;  %v155_v27 = vmul.f32 %v151_v18, %v148_v25  ;;  %v156_v28 = vmul.f32 %v152_v19, %v148_v25  ;;  %v157_v29 = vmul.f32 %v153_v20, %v148_v25 }
  0x85   :  { %v158_v31 = vadd.f32 %v154_v26, %v128_v21  ;;  %v159_v32 = vadd.f32 %v155_v27, %v129_v22  ;;  %v160_v33 = vadd.f32 %v156_v28, %v130_v23  ;;  %v161_v34 = vadd.f32 %v157_v29, %v131_v24 }
  0x87   :  { %v169_v35 = vadd.f32 %v166_v30, %v159_v32  ;;  %v171_v36 = vadd.f32 %v166_v30, %v161_v34  ;;  %v168_v37 = vadd.f32 %v166_v30, %v158_v31  ;;  %v170_v38 = vadd.f32 %v166_v30, %v160_v33 }
  0x89   :  { %v176_v39 = vrot.slane %v169_v35, 4  ;;  %v177_v40 = vrot.slane %v171_v36, 4 }
  0x8b   :  { %v179_v41 = vsel %vm178_vm0, %v168_v37, %v176_v39  ;;  %v180_v42 = vsel %vm178_vm0, %v170_v38, %v177_v40 }
  0x8c   :  { %183 = vst [vmem:[#allocation5] sm:$0xff] %v179_v41 }
  0x8d   :  { %184 = vst [vmem:[#allocation5 + $0x8] sm:$0xff] %v180_v42 }
  0x8e   :  { %195 = dma.vmem_to_hbm [thread:$0]  %s191_s2, 256, %s193_s28, [#allocation4]  }
  0x8f   :  { %259 = dma.done.wait [#allocation4], 256  }
  0x90   :  { %260 = vsyncadd [#allocation4], 4294967040 }
  0x91   :  { %200 = vsyncpa [#allocation3], 1 }
  0x92   :  { %201 = vsyncpa [#allocation4], 1 }

</bundles_post_ra>
